<compile_context>
chip_gen: v5e
topology: v5e:2x2
jax: 0.10.0
libtpu: 0.0.40
codegen_flags: <defaults>
</compile_context>

<pallas_src>
import math

import jax
import jax.numpy as jnp
from jax.experimental import pallas as pl
from jax.experimental.pallas import tpu as pltpu


# ----------------------------- model dims (small) ---------------------------
S = 8           # sequence length
N = 2           # batch
D_MODEL = 32    # C
NHEAD = 4
HEAD_DIM = D_MODEL // NHEAD
DIM_FF = 64


# --------------------------------- kernel -----------------------------------
def encoder_layer_kernel(
    x_ref,       # (1, S, C)   one batch element's rows
    wqkv_ref,    # (C, 3C)     fused q|k|v projection; q columns pre-scaled by hd**-0.5
    bqkv_ref,    # (1, 3C)     fused q|k|v bias; q part pre-scaled
    wo_ref,      # (C, C)      attention out-projection
    bo_ref,      # (1, C)
    w1_ref,      # (C, F)      feed-forward linear 1 (stored transposed: x @ W)
    b1_ref,      # (1, F)
    w2_ref,      # (F, C)      feed-forward linear 2
    b2_ref,      # (1, C)
    eps_ref,     # (1,) SMEM   BasicNorm eps (already exp(eps_log))
    out_ref,     # (1, S, C)
):
    f32 = jnp.float32
    x = x_ref[0]                                                 # (S, C)

    # ---- self attention -----------------------------------------------------
    # One fused QKV matmul (96 output lanes) instead of 12 narrow per-head dots.
    qkv = jnp.dot(x, wqkv_ref[...], preferred_element_type=f32) + bqkv_ref[...]  # (S, 3C)

    ctx_heads = []
    for h in range(NHEAD):                                       # static (unrolled) head loop
        q = qkv[:, h * HEAD_DIM:(h + 1) * HEAD_DIM]                              # (S, hd)
        k = qkv[:, D_MODEL + h * HEAD_DIM:D_MODEL + (h + 1) * HEAD_DIM]          # (S, hd)
        v = qkv[:, 2 * D_MODEL + h * HEAD_DIM:2 * D_MODEL + (h + 1) * HEAD_DIM]  # (S, hd)

        s = jax.lax.dot_general(q, k, (((1,), (1,)), ((), ())),
                                preferred_element_type=f32)       # (S, S) scores
        s = s - jnp.max(s, axis=-1, keepdims=True)                # stable softmax
        p = jnp.exp(s)
        p = p / jnp.sum(p, axis=-1, keepdims=True)                # exact denominator

        ctx_heads.append(jnp.dot(p, v, preferred_element_type=f32))  # (S, hd)

    # Assemble heads into one (S, C) slab; single out-proj matmul, residual once.
    ctx = jnp.concatenate(ctx_heads, axis=-1)                     # (S, C)
    attn = jnp.dot(ctx, wo_ref[...], preferred_element_type=f32) + bo_ref[...]
    x1 = x + attn

    # ---- feed-forward (ActivationBalancer is identity in fwd; DoubleSwish) ----
    h1 = jnp.dot(x1, w1_ref[...], preferred_element_type=f32) + b1_ref[...]
    h1 = h1 * jax.nn.sigmoid(h1 - 1.0)                            # DoubleSwish: x*sigmoid(x-1)
    x2 = x1 + jnp.dot(h1, w2_ref[...], preferred_element_type=f32) + b2_ref[...]

    # ---- balancer (identity in fwd) + BasicNorm ----
    mean_sq = jnp.mean(x2 * x2, axis=-1, keepdims=True)           # (S, 1)
    out_ref[0] = x2 * jax.lax.rsqrt(mean_sq + eps_ref[0])
    # TODO(synk): src_mask / src_key_padding_mask, training-mode dropout, and
    #             layer-bypass (alpha != 1.0) are not modeled; eval-mode forward only.


# ------------------------ one-time parameter preparation ---------------------
def prepare_kernel_params(p):
    """Constant re-layout of module-style params into the kernel's layout."""
    scaling = float(HEAD_DIM) ** -0.5
    # Fold 1/sqrt(head_dim) into the Q columns of the fused projection.
    col_scale = jnp.concatenate(
        [jnp.full((D_MODEL,), scaling, jnp.float32),
         jnp.ones((2 * D_MODEL,), jnp.float32)])                  # (3C,)
    return {
        "wqkv": (p["wqkv"] * col_scale[None, :]).astype(jnp.float32),   # (C, 3C)
        "bqkv": (p["bqkv"] * col_scale[None, :]).astype(jnp.float32),   # (1, 3C)
        "wo": p["wo"], "bo": p["bo"],
        "w1": p["w1"], "b1": p["b1"], "w2": p["w2"], "b2": p["b2"],
        # exp() folded here so the kernel just adds a scalar.
        "eps": jnp.exp(p["eps_log"]).reshape(1).astype(jnp.float32),    # (1,) SMEM
    }


# --------------------------------- wrapper -----------------------------------
def transformer_encoder_layer(src, kp):
    """src: (S, N, C) float32 -> (S, N, C) float32 (eval-mode forward)."""
    s_len, n_batch, c = src.shape
    # Batch-major layout so each grid step gets one batch element's contiguous
    # (S, C) rows.  At these sizes the wrapper transposes are negligible.
    x_nsc = jnp.transpose(src, (1, 0, 2))                        # (N, S, C)

    full = lambda shape: pl.BlockSpec(shape, lambda n: (0,) * len(shape))

    out = pl.pallas_call(
        encoder_layer_kernel,
        out_shape=jax.ShapeDtypeStruct((n_batch, s_len, c), jnp.float32),
        grid=(n_batch,),
        in_specs=[
            pl.BlockSpec((1, s_len, c), lambda n: (n, 0, 0)),    # x (one batch element)
            full((D_MODEL, 3 * D_MODEL)),                        # fused wqkv
            full((1, 3 * D_MODEL)),                              # fused bqkv
            full((D_MODEL, D_MODEL)),                            # wo
            full((1, D_MODEL)),                                  # bo
            full((D_MODEL, DIM_FF)),                             # w1
            full((1, DIM_FF)),                                   # b1
            full((DIM_FF, D_MODEL)),                             # w2
            full((1, D_MODEL)),                                  # b2
            pl.BlockSpec(memory_space=pltpu.MemorySpace.SMEM),   # eps scalar
        ],
        out_specs=pl.BlockSpec((1, s_len, c), lambda n: (n, 0, 0)),
        compiler_params=pltpu.CompilerParams(
            dimension_semantics=("parallel",)),                  # megacore on v7x
    )(x_nsc, kp["wqkv"], kp["bqkv"], kp["wo"], kp["bo"],
      kp["w1"], kp["b1"], kp["w2"], kp["b2"], kp["eps"])

    return jnp.transpose(out, (1, 0, 2))                         # back to (S, N, C)


# ---------------------------- pure-JAX reference -----------------------------
def reference_forward(src, p):
    x = src                                                      # (S, N, C)
    scaling = float(HEAD_DIM) ** -0.5
    qkv = jnp.einsum("snc,cd->snd", x, p["wqkv"]) + p["bqkv"]
    q, k, v = jnp.split(qkv, 3, axis=-1)
    q = q.reshape(S, N, NHEAD, HEAD_DIM) * scaling
    k = k.reshape(S, N, NHEAD, HEAD_DIM)
    v = v.reshape(S, N, NHEAD, HEAD_DIM)
    s = jnp.einsum("qnhd,knhd->nhqk", q, k)
    a = jnp.einsum("nhqk,knhd->qnhd", jax.nn.softmax(s, axis=-1), v).reshape(S, N, D_MODEL)
    a = a @ p["wo"] + p["bo"]
    x1 = x + a
    h1 = x1 @ p["w1"] + p["b1"]
    h1 = h1 * jax.nn.sigmoid(h1 - 1.0)
    x2 = x1 + h1 @ p["w2"] + p["b2"]
    scales = jax.lax.rsqrt(jnp.mean(x2 * x2, axis=-1, keepdims=True)
                           + jnp.exp(p["eps_log"][0, 0]))
    return x2 * scales


# ----------------------------------- main ------------------------------------
if __name__ == "__main__":
    key = jax.random.PRNGKey(0)
    ks = jax.random.split(key, 10)

    def init(k, shape, scale=0.1):
        return (scale * jax.random.normal(k, shape)).astype(jnp.float32)

    params = {
        # attention in_proj / out_proj (stored transposed: x @ W)
        "wqkv": init(ks[0], (D_MODEL, 3 * D_MODEL)),
        "bqkv": init(ks[1], (1, 3 * D_MODEL)),
        "wo":   init(ks[2], (D_MODEL, D_MODEL)) * 0.25,   # out_proj initial_scale=0.25
        "bo":   init(ks[3], (1, D_MODEL)) * 0.25,
        # feed forward
        "w1":   init(ks[4], (D_MODEL, DIM_FF)),
        "b1":   init(ks[5], (1, DIM_FF)),
        "w2":   init(ks[6], (DIM_FF, D_MODEL)) * 0.25,    # initial_scale=0.25
        "b2":   init(ks[7], (1, D_MODEL)) * 0.25,
        # BasicNorm learnable log-eps, initialized to log(0.25)
        "eps_log": jnp.full((1, 1), math.log(0.25), dtype=jnp.float32),
    }

    kparams = prepare_kernel_params(params)
    src = jax.random.normal(ks[8], (S, N, D_MODEL), dtype=jnp.float32)

    out = transformer_encoder_layer(src, kparams)
    out = jax.block_until_ready(out)

    ref = reference_forward(src, params)
    assert out.shape == (S, N, D_MODEL)
    # 1e-3 tolerance covers default TPU matmul precision differences between the
    # in-kernel MXU dots and the XLA reference einsums (softmax is now exact).
    if not jnp.allclose(out, ref, atol=1e-3, rtol=1e-3):
        max_err = float(jnp.max(jnp.abs(out - ref)))
        raise AssertionError(
            f"Pallas kernel output mismatch vs JAX reference (max |err| = {max_err})")

    print("KERNEL_OK")
</pallas_src>

<mosaic_0001>
module attributes {stable_mosaic.version = 11 : i64} {
  func.func @encoder_layer_kernel(%arg0: i32, %arg1: memref<1x8x32xf32, #tpu.memory_space<vmem>>, %arg2: memref<32x96xf32, #tpu.memory_space<vmem>>, %arg3: memref<1x96xf32, #tpu.memory_space<vmem>>, %arg4: memref<32x32xf32, #tpu.memory_space<vmem>>, %arg5: memref<1x32xf32, #tpu.memory_space<vmem>>, %arg6: memref<32x64xf32, #tpu.memory_space<vmem>>, %arg7: memref<1x64xf32, #tpu.memory_space<vmem>>, %arg8: memref<64x32xf32, #tpu.memory_space<vmem>>, %arg9: memref<1x32xf32, #tpu.memory_space<vmem>>, %arg10: memref<1xf32, #tpu.memory_space<smem>>, %arg11: memref<1x8x32xf32, #tpu.memory_space<vmem>>) attributes {dimension_semantics = [#tpu.dimension_semantics<parallel>], iteration_bounds = array<i64: 2>, scalar_prefetch = 0 : i64, scratch_operands = 0 : i64, tpu.core_type = #tpu.core_type<tc>, window_params = [{transform_indices = @transform_0, window_bounds = array<i64: 1, 8, 32>}, {pipeline_mode = #tpu.pipeline_mode<synchronous>, transform_indices = @transform_1, window_bounds = array<i64: 32, 96>}, {pipeline_mode = #tpu.pipeline_mode<synchronous>, transform_indices = @transform_2, window_bounds = array<i64: 1, 96>}, {pipeline_mode = #tpu.pipeline_mode<synchronous>, transform_indices = @transform_3, window_bounds = array<i64: 32, 32>}, {pipeline_mode = #tpu.pipeline_mode<synchronous>, transform_indices = @transform_4, window_bounds = array<i64: 1, 32>}, {pipeline_mode = #tpu.pipeline_mode<synchronous>, transform_indices = @transform_5, window_bounds = array<i64: 32, 64>}, {pipeline_mode = #tpu.pipeline_mode<synchronous>, transform_indices = @transform_6, window_bounds = array<i64: 1, 64>}, {pipeline_mode = #tpu.pipeline_mode<synchronous>, transform_indices = @transform_7, window_bounds = array<i64: 64, 32>}, {pipeline_mode = #tpu.pipeline_mode<synchronous>, transform_indices = @transform_8, window_bounds = array<i64: 1, 32>}, {transform_indices = @transform_9, window_bounds = array<i64: 1>}, {transform_indices = @transform_10, window_bounds = array<i64: 1, 8, 32>}]} {
    %c0 = arith.constant 0 : index
    %c0_0 = arith.constant 0 : index
    %c0_1 = arith.constant 0 : index
    %0 = vector.load %arg1[%c0, %c0_0, %c0_1] : memref<1x8x32xf32, #tpu.memory_space<vmem>>, vector<1x8x32xf32>
    %1 = vector.shape_cast %0 : vector<1x8x32xf32> to vector<8x32xf32>
    %c0_2 = arith.constant 0 : index
    %c0_3 = arith.constant 0 : index
    %2 = vector.load %arg2[%c0_2, %c0_3] : memref<32x96xf32, #tpu.memory_space<vmem>>, vector<32x96xf32>
    %cst = arith.constant dense<0.000000e+00> : vector<8x96xf32>
    %3 = tpu.matmul %1, %2, %cst {dimension_numbers = #tpu.dot_dimension_numbers<[1], [0], [0], [1], [0, 0, 1, 1], [], []>} : vector<8x32xf32>, vector<32x96xf32>, vector<8x96xf32> -> vector<8x96xf32>
    %c0_4 = arith.constant 0 : index
    %c0_5 = arith.constant 0 : index
    %4 = vector.load %arg3[%c0_4, %c0_5] : memref<1x96xf32, #tpu.memory_space<vmem>>, vector<1x96xf32>
    %5 = vector.broadcast %4 : vector<1x96xf32> to vector<8x96xf32>
    %6 = arith.addf %3, %5 : vector<8x96xf32>
    %7 = vector.extract_strided_slice %6 {offsets = [0, 0], sizes = [8, 8], strides = [1, 1]} : vector<8x96xf32> to vector<8x8xf32>
    %8 = vector.extract_strided_slice %6 {offsets = [0, 32], sizes = [8, 8], strides = [1, 1]} : vector<8x96xf32> to vector<8x8xf32>
    %9 = vector.extract_strided_slice %6 {offsets = [0, 64], sizes = [8, 8], strides = [1, 1]} : vector<8x96xf32> to vector<8x8xf32>
    %cst_6 = arith.constant dense<0.000000e+00> : vector<8x8xf32>
    %10 = tpu.matmul %7, %8, %cst_6 {dimension_numbers = #tpu.dot_dimension_numbers<[1], [1], [0], [0], [0, 0, 1, 0], [], []>} : vector<8x8xf32>, vector<8x8xf32>, vector<8x8xf32> -> vector<8x8xf32>
    %cst_7 = arith.constant dense<0xFF800000> : vector<8xf32>
    %11 = vector.multi_reduction <maximumf>, %10, %cst_7 [1] : vector<8x8xf32> to vector<8xf32>
    %12 = vector.shape_cast %11 : vector<8xf32> to vector<8x1xf32>
    %13 = vector.broadcast %12 : vector<8x1xf32> to vector<8x8xf32>
    %14 = arith.subf %10, %13 : vector<8x8xf32>
    %15 = math.exp %14 : vector<8x8xf32>
    %cst_8 = arith.constant dense<0.000000e+00> : vector<8xf32>
    %16 = vector.multi_reduction <add>, %15, %cst_8 [1] : vector<8x8xf32> to vector<8xf32>
    %17 = vector.shape_cast %16 : vector<8xf32> to vector<8x1xf32>
    %18 = vector.broadcast %17 : vector<8x1xf32> to vector<8x8xf32>
    %19 = arith.divf %15, %18 : vector<8x8xf32>
    %cst_9 = arith.constant dense<0.000000e+00> : vector<8x8xf32>
    %20 = tpu.matmul %19, %9, %cst_9 {dimension_numbers = #tpu.dot_dimension_numbers<[1], [0], [0], [1], [0, 0, 1, 1], [], []>} : vector<8x8xf32>, vector<8x8xf32>, vector<8x8xf32> -> vector<8x8xf32>
    %21 = vector.extract_strided_slice %6 {offsets = [0, 8], sizes = [8, 8], strides = [1, 1]} : vector<8x96xf32> to vector<8x8xf32>
    %22 = vector.extract_strided_slice %6 {offsets = [0, 40], sizes = [8, 8], strides = [1, 1]} : vector<8x96xf32> to vector<8x8xf32>
    %23 = vector.extract_strided_slice %6 {offsets = [0, 72], sizes = [8, 8], strides = [1, 1]} : vector<8x96xf32> to vector<8x8xf32>
    %cst_10 = arith.constant dense<0.000000e+00> : vector<8x8xf32>
    %24 = tpu.matmul %21, %22, %cst_10 {dimension_numbers = #tpu.dot_dimension_numbers<[1], [1], [0], [0], [0, 0, 1, 0], [], []>} : vector<8x8xf32>, vector<8x8xf32>, vector<8x8xf32> -> vector<8x8xf32>
    %cst_11 = arith.constant dense<0xFF800000> : vector<8xf32>
    %25 = vector.multi_reduction <maximumf>, %24, %cst_11 [1] : vector<8x8xf32> to vector<8xf32>
    %26 = vector.shape_cast %25 : vector<8xf32> to vector<8x1xf32>
    %27 = vector.broadcast %26 : vector<8x1xf32> to vector<8x8xf32>
    %28 = arith.subf %24, %27 : vector<8x8xf32>
    %29 = math.exp %28 : vector<8x8xf32>
    %cst_12 = arith.constant dense<0.000000e+00> : vector<8xf32>
    %30 = vector.multi_reduction <add>, %29, %cst_12 [1] : vector<8x8xf32> to vector<8xf32>
    %31 = vector.shape_cast %30 : vector<8xf32> to vector<8x1xf32>
    %32 = vector.broadcast %31 : vector<8x1xf32> to vector<8x8xf32>
    %33 = arith.divf %29, %32 : vector<8x8xf32>
    %cst_13 = arith.constant dense<0.000000e+00> : vector<8x8xf32>
    %34 = tpu.matmul %33, %23, %cst_13 {dimension_numbers = #tpu.dot_dimension_numbers<[1], [0], [0], [1], [0, 0, 1, 1], [], []>} : vector<8x8xf32>, vector<8x8xf32>, vector<8x8xf32> -> vector<8x8xf32>
    %35 = vector.extract_strided_slice %6 {offsets = [0, 16], sizes = [8, 8], strides = [1, 1]} : vector<8x96xf32> to vector<8x8xf32>
    %36 = vector.extract_strided_slice %6 {offsets = [0, 48], sizes = [8, 8], strides = [1, 1]} : vector<8x96xf32> to vector<8x8xf32>
    %37 = vector.extract_strided_slice %6 {offsets = [0, 80], sizes = [8, 8], strides = [1, 1]} : vector<8x96xf32> to vector<8x8xf32>
    %cst_14 = arith.constant dense<0.000000e+00> : vector<8x8xf32>
    %38 = tpu.matmul %35, %36, %cst_14 {dimension_numbers = #tpu.dot_dimension_numbers<[1], [1], [0], [0], [0, 0, 1, 0], [], []>} : vector<8x8xf32>, vector<8x8xf32>, vector<8x8xf32> -> vector<8x8xf32>
    %cst_15 = arith.constant dense<0xFF800000> : vector<8xf32>
    %39 = vector.multi_reduction <maximumf>, %38, %cst_15 [1] : vector<8x8xf32> to vector<8xf32>
    %40 = vector.shape_cast %39 : vector<8xf32> to vector<8x1xf32>
    %41 = vector.broadcast %40 : vector<8x1xf32> to vector<8x8xf32>
    %42 = arith.subf %38, %41 : vector<8x8xf32>
    %43 = math.exp %42 : vector<8x8xf32>
    %cst_16 = arith.constant dense<0.000000e+00> : vector<8xf32>
    %44 = vector.multi_reduction <add>, %43, %cst_16 [1] : vector<8x8xf32> to vector<8xf32>
    %45 = vector.shape_cast %44 : vector<8xf32> to vector<8x1xf32>
    %46 = vector.broadcast %45 : vector<8x1xf32> to vector<8x8xf32>
    %47 = arith.divf %43, %46 : vector<8x8xf32>
    %cst_17 = arith.constant dense<0.000000e+00> : vector<8x8xf32>
    %48 = tpu.matmul %47, %37, %cst_17 {dimension_numbers = #tpu.dot_dimension_numbers<[1], [0], [0], [1], [0, 0, 1, 1], [], []>} : vector<8x8xf32>, vector<8x8xf32>, vector<8x8xf32> -> vector<8x8xf32>
    %49 = vector.extract_strided_slice %6 {offsets = [0, 24], sizes = [8, 8], strides = [1, 1]} : vector<8x96xf32> to vector<8x8xf32>
    %50 = vector.extract_strided_slice %6 {offsets = [0, 56], sizes = [8, 8], strides = [1, 1]} : vector<8x96xf32> to vector<8x8xf32>
    %51 = vector.extract_strided_slice %6 {offsets = [0, 88], sizes = [8, 8], strides = [1, 1]} : vector<8x96xf32> to vector<8x8xf32>
    %cst_18 = arith.constant dense<0.000000e+00> : vector<8x8xf32>
    %52 = tpu.matmul %49, %50, %cst_18 {dimension_numbers = #tpu.dot_dimension_numbers<[1], [1], [0], [0], [0, 0, 1, 0], [], []>} : vector<8x8xf32>, vector<8x8xf32>, vector<8x8xf32> -> vector<8x8xf32>
    %cst_19 = arith.constant dense<0xFF800000> : vector<8xf32>
    %53 = vector.multi_reduction <maximumf>, %52, %cst_19 [1] : vector<8x8xf32> to vector<8xf32>
    %54 = vector.shape_cast %53 : vector<8xf32> to vector<8x1xf32>
    %55 = vector.broadcast %54 : vector<8x1xf32> to vector<8x8xf32>
    %56 = arith.subf %52, %55 : vector<8x8xf32>
    %57 = math.exp %56 : vector<8x8xf32>
    %cst_20 = arith.constant dense<0.000000e+00> : vector<8xf32>
    %58 = vector.multi_reduction <add>, %57, %cst_20 [1] : vector<8x8xf32> to vector<8xf32>
    %59 = vector.shape_cast %58 : vector<8xf32> to vector<8x1xf32>
    %60 = vector.broadcast %59 : vector<8x1xf32> to vector<8x8xf32>
    %61 = arith.divf %57, %60 : vector<8x8xf32>
    %cst_21 = arith.constant dense<0.000000e+00> : vector<8x8xf32>
    %62 = tpu.matmul %61, %51, %cst_21 {dimension_numbers = #tpu.dot_dimension_numbers<[1], [0], [0], [1], [0, 0, 1, 1], [], []>} : vector<8x8xf32>, vector<8x8xf32>, vector<8x8xf32> -> vector<8x8xf32>
    %63 = tpu.concatenate %20, %34, %48, %62 in 1 : vector<8x8xf32>, vector<8x8xf32>, vector<8x8xf32>, vector<8x8xf32> -> vector<8x32xf32>
    %c0_22 = arith.constant 0 : index
    %c0_23 = arith.constant 0 : index
    %64 = vector.load %arg4[%c0_22, %c0_23] : memref<32x32xf32, #tpu.memory_space<vmem>>, vector<32x32xf32>
    %cst_24 = arith.constant dense<0.000000e+00> : vector<8x32xf32>
    %65 = tpu.matmul %63, %64, %cst_24 {dimension_numbers = #tpu.dot_dimension_numbers<[1], [0], [0], [1], [0, 0, 1, 1], [], []>} : vector<8x32xf32>, vector<32x32xf32>, vector<8x32xf32> -> vector<8x32xf32>
    %c0_25 = arith.constant 0 : index
    %c0_26 = arith.constant 0 : index
    %66 = vector.load %arg5[%c0_25, %c0_26] : memref<1x32xf32, #tpu.memory_space<vmem>>, vector<1x32xf32>
    %67 = vector.broadcast %66 : vector<1x32xf32> to vector<8x32xf32>
    %68 = arith.addf %65, %67 : vector<8x32xf32>
    %69 = arith.addf %1, %68 : vector<8x32xf32>
    %c0_27 = arith.constant 0 : index
    %c0_28 = arith.constant 0 : index
    %70 = vector.load %arg6[%c0_27, %c0_28] : memref<32x64xf32, #tpu.memory_space<vmem>>, vector<32x64xf32>
    %cst_29 = arith.constant dense<0.000000e+00> : vector<8x64xf32>
    %71 = tpu.matmul %69, %70, %cst_29 {dimension_numbers = #tpu.dot_dimension_numbers<[1], [0], [0], [1], [0, 0, 1, 1], [], []>} : vector<8x32xf32>, vector<32x64xf32>, vector<8x64xf32> -> vector<8x64xf32>
    %c0_30 = arith.constant 0 : index
    %c0_31 = arith.constant 0 : index
    %72 = vector.load %arg7[%c0_30, %c0_31] : memref<1x64xf32, #tpu.memory_space<vmem>>, vector<1x64xf32>
    %73 = vector.broadcast %72 : vector<1x64xf32> to vector<8x64xf32>
    %74 = arith.addf %71, %73 : vector<8x64xf32>
    %cst_32 = arith.constant 1.000000e+00 : f32
    %75 = vector.broadcast %cst_32 : f32 to vector<8x64xf32>
    %76 = arith.subf %74, %75 : vector<8x64xf32>
    %77 = arith.negf %76 : vector<8x64xf32>
    %78 = math.exp %77 : vector<8x64xf32>
    %cst_33 = arith.constant 1.000000e+00 : f32
    %79 = vector.broadcast %cst_33 : f32 to vector<8x64xf32>
    %80 = arith.addf %79, %78 : vector<8x64xf32>
    %81 = arith.divf %79, %80 : vector<8x64xf32>
    %82 = arith.mulf %74, %81 : vector<8x64xf32>
    %c0_34 = arith.constant 0 : index
    %c0_35 = arith.constant 0 : index
    %83 = vector.load %arg8[%c0_34, %c0_35] : memref<64x32xf32, #tpu.memory_space<vmem>>, vector<64x32xf32>
    %cst_36 = arith.constant dense<0.000000e+00> : vector<8x32xf32>
    %84 = tpu.matmul %82, %83, %cst_36 {dimension_numbers = #tpu.dot_dimension_numbers<[1], [0], [0], [1], [0, 0, 1, 1], [], []>} : vector<8x64xf32>, vector<64x32xf32>, vector<8x32xf32> -> vector<8x32xf32>
    %85 = arith.addf %69, %84 : vector<8x32xf32>
    %c0_37 = arith.constant 0 : index
    %c0_38 = arith.constant 0 : index
    %86 = vector.load %arg9[%c0_37, %c0_38] : memref<1x32xf32, #tpu.memory_space<vmem>>, vector<1x32xf32>
    %87 = vector.broadcast %86 : vector<1x32xf32> to vector<8x32xf32>
    %88 = arith.addf %85, %87 : vector<8x32xf32>
    %89 = arith.mulf %88, %88 : vector<8x32xf32>
    %cst_39 = arith.constant dense<0.000000e+00> : vector<8xf32>
    %90 = vector.multi_reduction <add>, %89, %cst_39 [1] : vector<8x32xf32> to vector<8xf32>
    %91 = vector.shape_cast %90 : vector<8xf32> to vector<8x1xf32>
    %cst_40 = arith.constant 3.200000e+01 : f32
    %92 = vector.broadcast %cst_40 : f32 to vector<8x1xf32>
    %93 = arith.divf %91, %92 : vector<8x1xf32>
    %c0_41 = arith.constant 0 : index
    %94 = memref.load %arg10[%c0_41] : memref<1xf32, #tpu.memory_space<smem>>
    %95 = vector.broadcast %94 : f32 to vector<8x1xf32>
    %96 = arith.addf %93, %95 : vector<8x1xf32>
    %97 = math.rsqrt %96 : vector<8x1xf32>
    %98 = vector.broadcast %97 : vector<8x1xf32> to vector<8x32xf32>
    %99 = arith.mulf %88, %98 : vector<8x32xf32>
    %c0_42 = arith.constant 0 : index
    %c0_43 = arith.constant 0 : index
    %c0_44 = arith.constant 0 : index
    %100 = vector.load %arg11[%c0_42, %c0_43, %c0_44] : memref<1x8x32xf32, #tpu.memory_space<vmem>>, vector<1x8x32xf32>
    %101 = vector.shape_cast %100 : vector<1x8x32xf32> to vector<8x32xf32>
    %102 = vector.shape_cast %99 : vector<8x32xf32> to vector<1x8x32xf32>
    tpu.vector_store %arg11[%c0_42, %c0_43, %c0_44], %102 {strides = array<i32>} : memref<1x8x32xf32, #tpu.memory_space<vmem>>, vector<1x8x32xf32>,
    return
  }
  func.func @transform_0(%arg0: i32) -> (i32, i32, i32) {
    %c0_i32 = arith.constant 0 : i32
    %c0_i32_0 = arith.constant 0 : i32
    %c0_i32_1 = arith.constant 0 : i32
    return %arg0, %c0_i32, %c0_i32_0 : i32, i32, i32
  }
  func.func @transform_1(%arg0: i32) -> (i32, i32) {
    %c0_i32 = arith.constant 0 : i32
    %c0_i32_0 = arith.constant 0 : i32
    %c0_i32_1 = arith.constant 0 : i32
    return %c0_i32, %c0_i32_0 : i32, i32
  }
  func.func @transform_2(%arg0: i32) -> (i32, i32) {
    %c0_i32 = arith.constant 0 : i32
    %c0_i32_0 = arith.constant 0 : i32
    %c0_i32_1 = arith.constant 0 : i32
    return %c0_i32, %c0_i32_0 : i32, i32
  }
  func.func @transform_3(%arg0: i32) -> (i32, i32) {
    %c0_i32 = arith.constant 0 : i32
    %c0_i32_0 = arith.constant 0 : i32
    %c0_i32_1 = arith.constant 0 : i32
    return %c0_i32, %c0_i32_0 : i32, i32
  }
  func.func @transform_4(%arg0: i32) -> (i32, i32) {
    %c0_i32 = arith.constant 0 : i32
    %c0_i32_0 = arith.constant 0 : i32
    %c0_i32_1 = arith.constant 0 : i32
    return %c0_i32, %c0_i32_0 : i32, i32
  }
  func.func @transform_5(%arg0: i32) -> (i32, i32) {
    %c0_i32 = arith.constant 0 : i32
    %c0_i32_0 = arith.constant 0 : i32
    %c0_i32_1 = arith.constant 0 : i32
    return %c0_i32, %c0_i32_0 : i32, i32
  }
  func.func @transform_6(%arg0: i32) -> (i32, i32) {
    %c0_i32 = arith.constant 0 : i32
    %c0_i32_0 = arith.constant 0 : i32
    %c0_i32_1 = arith.constant 0 : i32
    return %c0_i32, %c0_i32_0 : i32, i32
  }
  func.func @transform_7(%arg0: i32) -> (i32, i32) {
    %c0_i32 = arith.constant 0 : i32
    %c0_i32_0 = arith.constant 0 : i32
    %c0_i32_1 = arith.constant 0 : i32
    return %c0_i32, %c0_i32_0 : i32, i32
  }
  func.func @transform_8(%arg0: i32) -> (i32, i32) {
    %c0_i32 = arith.constant 0 : i32
    %c0_i32_0 = arith.constant 0 : i32
    %c0_i32_1 = arith.constant 0 : i32
    return %c0_i32, %c0_i32_0 : i32, i32
  }
  func.func @transform_9(%arg0: i32) -> i32 {
    %c0_i32 = arith.constant 0 : i32
    %c0_i32_0 = arith.constant 0 : i32
    return %c0_i32 : i32
  }
  func.func @transform_10(%arg0: i32) -> (i32, i32, i32) {
    %c0_i32 = arith.constant 0 : i32
    %c0_i32_0 = arith.constant 0 : i32
    %c0_i32_1 = arith.constant 0 : i32
    return %arg0, %c0_i32, %c0_i32_0 : i32, i32, i32
  }
}

</mosaic_0001>

<bundles_post_ra>
// kernel: tpu_custom_call.1
= control target key start
LH: loop header
LB: loop body
LE: loop exit
PB: predicated region body
PF: predicated region fallthrough
CT: control target
= control target key end

     0   :  { %s1515_s0 = inlined_call_operand.hbm [shape: f32[2,8,32], index: 0, kind: input, shape index: {}]   ;;  %s1516_s1 = inlined_call_operand.vmem [shape: f32[32,96], index: 1, kind: input, shape index: {}]   ;;  %s1517_s2 = inlined_call_operand.vmem [shape: f32[1,96], index: 2, kind: input, shape index: {}]   ;;  %s1518_s3 = inlined_call_operand.vmem [shape: f32[32,32], index: 3, kind: input, shape index: {}]   ;;  %s1519_s4 = inlined_call_operand.vmem [shape: f32[1,32], index: 4, kind: input, shape index: {}]   ;;  %s1520_s5 = inlined_call_operand.vmem [shape: f32[32,64], index: 5, kind: input, shape index: {}]   ;;  %s1521_s6 = inlined_call_operand.vmem [shape: f32[1,64], index: 6, kind: input, shape index: {}]   ;;  %s1522_s7 = inlined_call_operand.vmem [shape: f32[64,32], index: 7, kind: input, shape index: {}]   ;;  %s1523_s8 = inlined_call_operand.vmem [shape: f32[1,32], index: 8, kind: input, shape index: {}]   ;;  %s1524_s9 = inlined_call_operand.<no memory space> [shape: f32[1], index: 9, kind: input, shape index: {}]   ;;  %s1525_s10 = inlined_call_operand.hbm [shape: f32[2,8,32], index: 10, kind: output, shape index: {}]  }
   0x1   :  { %15 = sst [smem:[#allocation2]] %s1524_s9 }
   0x2   :  { %16 = vsyncpa [#allocation4], 0 }
   0x3   :  { %18 = vsyncpa [#allocation4 + $0x1], 0 }
   0x4   :  { %19 = vsyncpa [#allocation5], 0 }
   0x5   :  { %21 = vsyncpa [#allocation5 + $0x1], 0  ;;  %s1265_s15 = smov 0   ;;  %s1267_s16 = smov 0  }
   0x6   :  { %s1269_s17 = smov 0   ;;  %s1271_s18 = smov 0  }
   0x7 LB: > { %1529 = sst [smem:[#allocation9_spill]] %s1186_s17  ;;  %s1286_s9 = sadd.s32 4294967295, %s1190_s18   ;;  %s1190_s18 = sphi %s1271_s18, %s1538_s18   ;;  %s1186_s17 = sphi %s1269_s17, %s1540_s17   ;;  %s1182_s16 = sphi %s1267_s16, %s1542_s16   ;;  %s1178_s15 = sphi %s1265_s15, %s1541_s15  }
   0x8   : > { %s975_s19 = sadd.s32 4294967294, %s1190_s18   ;;  %s1290_s20 = sadd.s32 1, %s1190_s18  }
   0x9   : > { %1530 = sst [smem:[#allocation10_spill]] %s1290_s20  ;;  %s34_s21 = sadd.s32 1, %s1186_s17 }
   0xa   : > { %s31_s22 = ssub.s32 %s1190_s18, %s1290_s20  ;;  %p41_p0 = scmp.ne.s32.totalorder %s1186_s17, %s1182_s16 }
   0xb   : > { %p32_p1 = scmp.eq.s32.totalorder %s31_s22, 0  ;;  %p42_p2 = scmp.eq.s32.totalorder %s1190_s18, 0 }
   0xc   : > { %p47_p3 = scmp.ne.s32.totalorder %s1182_s16, %s1178_s15  ;;  %p48_p4 = scmp.eq.s32.totalorder %s1286_s9, 0 }
   0xd   : > { %s1302_s23 = scalar_select %p32_p1, %s1186_s17, %s34_s21  }
   0xe   : > { %p1304_p5 = por %p42_p2, %p41_p0  ;;  %p1308_p6 = por %p48_p4, %p47_p3 }
   0xf   : > { %1531 = sst [smem:[#allocation11_spill]] %s1302_s23  ;;  %p260_p7 = scmp.eq.s32.totalorder %s1286_s9, 1 }
  0x10   : > { %p266_p8 = scmp.eq.s32.totalorder %s975_s19, 1  ;;  %p1017_p10 = scmp.lt.s32.totalorder %s1190_s18, 2 }
  0x11   : > { %p1315_p11 = por %p260_p7, %p41_p0  ;;  %s313_s28 = sand.u32 1, %s1186_s17  }
  0x12   : > { %p1319_p12 = por %p266_p8, %p47_p3  ;;  %s979_s29 = sshll.u32 %s1190_s18, 3 }
  0x13   : > { %s978_s30 = sshll.u32 %s313_s28, 3  ;;  %s321_s13 = scalar_lea.hbm %s1515_s0, %s979_s29 }
  0x14   : > { %s323_s14 = sshll.u32 %s321_s13, 4  ;;  %s317_s19 = scalar_lea.vmem [#allocation3], %s978_s30  ;;  %s324_s14 = int_to_ptr.hbm [resolvable:$true] %s323_s14 }
  0x15   : > { %s325_s21 = sshll.u32 %s317_s19, 4  ;;  %p1330_p13 = pnand %p1017_p10, %p1304_p5  ;;  %s326_s21 = int_to_ptr.vmem [resolvable:$true] %s325_s21 }
  0x16   : > { %p980_p0 = scmp.ge.s32.totalorder %s1190_s18, 1  ;;  %p330_p1 = scmp.lt.s32.totalorder %s1190_s18, 3 }
  0x17   : > { %s314_s23 = scalar_lea.sflag [#allocation4], %s313_s28  ;;  %s1094_s17 = sshra.s32 %s324_s14, 4  ;;  %s1095_s17 = int_to_ptr.hbm [resolvable:$true] %s1094_s17 }
  0x18   : > { %s1096_s20 = scalar_lea.hbm %s1095_s17, 8  ;;  %p1098_p3 = pneg %p1330_p13 }
  0x19   : > { %p1097_p2 = scmp.ne.s32.totalorder %s1095_s17, %s1096_s20  ;;  %s1101_s24 = scalar_lea.hbm %s1515_s0, 16 }
  0x1a   : > { %p1102_p5 = scmp.lt.s32.totalorder %s1095_s17, %s1515_s0  ;;  %p1103_p8 = scmp.lt.s32.totalorder %s1101_s24, %s1096_s20 }
  0x1b   : > { %p1099_p4 = pnand %p1098_p3, %p1097_p2 }
  0x1c   : > { %p1104_p10 = por %p1103_p8, %p1102_p5 }
  0x1d   : > { %p1100_p7 = pneg %p1099_p4 }
  0x1f   : > { %p1105_p9 = pnand %p1104_p10, %p1100_p7 }
  0x21   : > { %1108 = shalt.err (!%p1105_p9)
}
  0x22   : > { %1012 = dma.hbm_to_vmem [thread:$0]  (!%p1330_p13), %s324_s14, 128, %s326_s21, %s314_s23  }
  0x23   : > { %p331_p2 = pnand %p980_p0, %p330_p1 }
  0x24   : > { %s1351_s28 = sand.u32 (!%p331_p2), 1, %s1182_s16  }
  0x25   : > { %334 = sbr.rel (%p331_p2) target bundleno = 1926 (0x786), region = 60  ;;  %s981_s17 = sshll.u32 (!%p331_p2), %s1351_s28, 3 }
  0x26   : > { %s337_s20 = scalar_lea.sflag (!%p331_p2), [#allocation4], %s1351_s28  ;;  %s340_s13 = scalar_lea.vmem (!%p331_p2), [#allocation3], %s981_s17 }
  0x2a   : > { %1169 = dma.done.wait (%p1308_p6), %s337_s20, 128  }
  0x2b   : > { %1171 = vsyncadd (%p1308_p6), %s337_s20, 4294967168  ;;  %v382_v0 = vld [vmem:[%s1516_s1 + $0x18] sm:$0xff]  ;;  %v381_v1 = vld [vmem:[%s1516_s1 + $0x10] sm:$0xff]  ;;  %vm387_vm0 = vcmask 261120   ;;  %s1192_s12 = smov 64   ;;  %s1193_s20 = smov 120  }
  0x2c   : > { %403 = vmatpush.msra.mxu0 %v382_v0  ;;  %v380_v2 = vld [vmem:[%s1516_s1 + $0x8] sm:$0xff]  ;;  %v379_v3 = vld [vmem:[%s1516_s1] sm:$0xff]  ;;  %s1195_s23 = smov 56   ;;  %s1196_s14 = smov 88   ;;  %vm414_vm1 = vcmask 64512  }
  0x2d   : > { %v1373_v4 = vld [vmem:[%s340_s13] sm:$0xff]  ;;  %s1194_s13 = smov 96   ;;  %s1197_s19 = smov 104  }
  0x2e   : > { %404 = vmatpush.msra.mxu0 %v381_v1  ;;  %v1066_v5 = vld [vmem:[%s1517_s2] ss:$0 sm:$0xff]  ;;  %s1198_s21 = smov 72   ;;  %s1199_s22 = smov 80  }
  0x2f   : > { %s1200_s29 = smov 112   ;;  %s1201_s30 = smov 40  }
  0x30   : > { %405 = vmatpush.msra.mxu0 %v380_v2  ;;  %s1202_s24 = smov 8   ;;  %s1203_s25 = smov 48  }
  0x31   : > { %s1204_s11 = smov 16  }
  0x32   : > { %406 = vmatpush.msra.mxu0 %v379_v3 }
  0x33   : > { %983 = vmatmul.msk.f32.vlgmr.msra.gmra.mxu0 %vm387_vm0, %v1373_v4 }
  0xb0   : > { %v408_v6 = vpop.f32.mrf.mxu0 }
  0xb1   : > { %v1380_v7 = vadd.f32 %v1066_v5, %v408_v6 }
  0xb3   : > { %463 = vrot.lane.b32.xlu2 %v1380_v7, %s1192_s12  ;;  %489 = vrot.lane.b32.xlu1 %v1380_v7, %s1193_s20  ;;  %s1205_s12 = smov 24   ;;  %s1002_s20 = sshll.u32 %s1286_s9, 3 }
  0xb4   : > { %412 = vrot.lane.b32.xlu0 %v1380_v7, %s1194_s13  ;;  %s890_s9 = scalar_lea.sflag [#allocation5], %s1351_s28 }
  0xbb   : > { %541 = vrot.lane.b32.xlu2 %v1380_v7, %s1195_s23 }
  0xbc   : > { %491 = vrot.lane.b32.xlu0 %v1380_v7, %s1196_s14  ;;  %s900_s14 = scalar_lea.hbm %s1525_s10, %s1002_s20 }
 0x10d   : > { %v464_v8 = vpop.permute.xlu2 %463 }
 0x10e   : > { %484 = vmatpush.msra.mxu2 %v464_v8 }
 0x115   : > { %v542_v9 = vpop.permute.xlu2 %541 }
 0x116   : > { %562 = vmatpush.msrb.mxu2 %v542_v9 }
 0x125   : > { %v490_v12 = vpop.permute.xlu1 %489 }
 0x126   : > { %v413_v10 = vpop.permute.xlu0 %412 }
 0x127   : > { %984 = vmatpush.xpose.msk.msra.mxu1 %vm414_vm1, %v413_v10 }
 0x12a   : > { %985 = vmatmul.msk.f32.vlgmr.msra.gmra.mxu1 %vm414_vm1, %v1380_v7 }
 0x12e   : > { %v492_v11 = vpop.permute.xlu0 %491 }
 0x12f   : > { %987 = vmatpush.xpose.msk.msra.mxu3 %vm414_vm1, %v492_v11 }
 0x132   : > { %988 = vmatmul.msk.f32.vlgmr.msra.gmra.mxu3 %vm414_vm1, %v490_v12 }
 0x1a7   : > { %v436_v13 = vpop.f32.mrf.mxu1 }
 0x1a8   : > { %v439_v14 = vsel %vm414_vm1, %v436_v13, -inf }
 0x1a9   : > { %440 = vmax.xlane.f32.xlu1 %v439_v14 }
 0x1b5   : > { %v514_v15 = vpop.f32.mrf.mxu3 }
 0x1b6   : > { %v517_v16 = vsel %vm414_vm1, %v514_v15, -inf }
 0x1b7   : > { %518 = vmax.xlane.f32.xlu2 %v517_v16 }
 0x1c2   : > { %645 = vrot.lane.b32.xlu1 %v1380_v7, %s1197_s19  ;;  %s377_s19 = scalar_lea.vmem [#allocation6], %s981_s17  ;;  %s1144_s17 = scalar_lea.hbm %s1525_s10, 16 }
 0x1cf   : > { %647 = vrot.lane.b32.xlu2 %v1380_v7, %s1198_s21  ;;  %s902_s21 = sshll.u32 %s377_s19, 4  ;;  %s903_s21 = int_to_ptr.vmem [resolvable:$true] %s902_s21 }
 0x21c   : > { %v441_v17 = vpop.xlane.xlu1 %440 }
 0x21d   : > { %v442_v18 = vsub.f32 %v436_v13, %v441_v17 }
 0x21f   : > { %v443_v19 = vmul.f32 1.442695, %v442_v18 }
 0x221   : > { %1070 = vpow2.f32 %v443_v19 }
 0x227   : > { %v1071_v20 = vpop.eup %1070 }
 0x228   : > { %v445_v21 = vsel %vm414_vm1, %v1071_v20, 0.0 }
 0x229   : > { %446 = vadd.xlane.f32.xlu2 %v445_v21 }
 0x22a   : > { %v519_v22 = vpop.xlane.xlu2 %518 }
 0x22b   : > { %v520_v23 = vsub.f32 %v514_v15, %v519_v22 }
 0x22d   : > { %v521_v24 = vmul.f32 1.442695, %v520_v23 }
 0x22f   : > { %1072 = vpow2.f32 %v521_v24 }
 0x232   : > { %v648_v27 = vpop.permute.xlu2 %647 }
 0x234   : > { %v646_v54 = vpop.permute.xlu1 %645 }
 0x235   : > { %v1073_v25 = vpop.eup %1072 }
 0x236   : > { %v523_v26 = vsel %vm414_vm1, %v1073_v25, 0.0 }
 0x237   : > { %524 = vadd.xlane.f32.xlu0 %v523_v26 }
 0x241   : > { %569 = vrot.lane.b32.xlu2 %v1380_v7, %s1199_s22  ;;  %s904_s22 = sshll.u32 %s900_s14, 4  ;;  %s905_s22 = int_to_ptr.hbm [resolvable:$true] %s904_s22 }
 0x24b   : > { %567 = vrot.lane.b32.xlu0 %v1380_v7, %s1200_s29  ;;  %s1138_s29 = sshra.s32 %s905_s22, 4  ;;  %s1139_s29 = int_to_ptr.hbm [resolvable:$true] %s1138_s29 }
 0x24c   : > { %p1145_p0 = scmp.lt.s32.totalorder %s1139_s29, %s1525_s10 }
 0x29c   : > { %v447_v28 = vpop.xlane.xlu2 %446 }
 0x29d   : > { %1074 = vrcp.f32 %v447_v28  ;;  %v459_v33 = vand.u32 2147483648, %v447_v28  ;;  %v457_v35 = vand.u32 2147483647, %v447_v28  ;;  %vm453_vm3 = vweird.f32 %v447_v28 }
 0x29f   : > { %v460_v38 = vor.u32 1.1754944e-38, %v459_v33  ;;  %vm458_vm5 = vcmp.eq.f32.partialorder %v457_v35, 8.507059e+37 }
 0x2a3   : > { %v1075_v29 = vpop.eup %1074 }
 0x2a4   : > { %v449_v30 = vmul.f32 %v1075_v29, %v447_v28  ;;  %v570_v31 = vpop.permute.xlu2 %569  ;;  %vm454_vm2 = vweird.f32 %v1075_v29 }
 0x2a5   : > { %990 = vmatpush.xpose.msk.msrb.mxu1 %vm414_vm1, %v570_v31  ;;  %vm455_vm4 = vmor %vm453_vm3, %vm454_vm2 }
 0x2a6   : > { %v450_v32 = vsub.f32 1.0, %v449_v30 }
 0x2a8   : > { %v451_v34 = vmul.f32 %v1075_v29, %v450_v32 }
 0x2aa   : > { %v525_v36 = vpop.xlane.xlu0 %524  ;;  %v452_v37 = vadd.f32 %v1075_v29, %v451_v34 }
 0x2ab   : > { %1076 = vrcp.f32 %v525_v36  ;;  %v537_v45 = vand.u32 2147483648, %v525_v36  ;;  %v535_v47 = vand.u32 2147483647, %v525_v36  ;;  %vm531_vm7 = vweird.f32 %v525_v36 }
 0x2ac   : > { %v456_v39 = vsel %vm455_vm4, %v1075_v29, %v452_v37  ;;  %v742_v37 = vld [vmem:[%s1518_s3 + $0x10] sm:$0xff]  ;;  %vm736_vm4 = vcmask 130048  }
 0x2ad   : > { %v461_v40 = vsel %vm458_vm5, %v460_v38, %v456_v39  ;;  %v538_v49 = vor.u32 1.1754944e-38, %v537_v45  ;;  %vm536_vm9 = vcmp.eq.f32.partialorder %v535_v47, 8.507059e+37  ;;  %v741_v38 = vld [vmem:[%s1518_s3 + $0x8] sm:$0xff]  ;;  %v740_v39 = vld [vmem:[%s1518_s3] sm:$0xff]  ;;  %vm738_vm5 = vcmask 195584  }
 0x2ae   : > { %v462_v41 = vmul.f32 %v1071_v20, %v461_v40  ;;  %v775_v40 = vld [vmem:[%s1520_s5 + $0x18] sm:$0xff] }
 0x2b0   : > { %986 = vmatmul.msk.f32.vlgmr.msra.gmra.mxu2 %vm414_vm1, %v462_v41  ;;  %v774_v41 = vld [vmem:[%s1520_s5 + $0x10] sm:$0xff] }
 0x2b1   : > { %v1077_v42 = vpop.eup %1076  ;;  %993 = vmatpush.xpose.msk.msra.mxu2 %vm414_vm1, %v648_v27 }
 0x2b2   : > { %v527_v43 = vmul.f32 %v1077_v42, %v525_v36  ;;  %vm532_vm6 = vweird.f32 %v1077_v42  ;;  %v743_v36 = vld [vmem:[%s1518_s3 + $0x18] sm:$0xff] }
 0x2b3   : > { %vm533_vm8 = vmor %vm531_vm7, %vm532_vm6  ;;  %763 = vmatpush.msra.mxu1 %v743_v36 }
 0x2b4   : > { %v528_v44 = vsub.f32 1.0, %v527_v43 }
 0x2b5   : > { %764 = vmatpush.msra.mxu1 %v742_v37 }
 0x2b6   : > { %v529_v46 = vmul.f32 %v1077_v42, %v528_v44 }
 0x2b7   : > { %765 = vmatpush.msra.mxu1 %v741_v38 }
 0x2b8   : > { %v530_v48 = vadd.f32 %v1077_v42, %v529_v46 }
 0x2b9   : > { %766 = vmatpush.msra.mxu1 %v740_v39 }
 0x2ba   : > { %v534_v50 = vsel %vm533_vm8, %v1077_v42, %v530_v48  ;;  %v773_v48 = vld [vmem:[%s1520_s5 + $0x8] sm:$0xff] }
 0x2bb   : > { %v539_v51 = vsel %vm536_vm9, %v538_v49, %v534_v50  ;;  %v772_v49 = vld [vmem:[%s1520_s5] sm:$0xff]  ;;  %vm832_vm9 = vcmask 523264  }
 0x2bc   : > { %v540_v52 = vmul.f32 %v1073_v25, %v539_v51  ;;  %v1067_v50 = vld [vmem:[%s1519_s4] ss:$0 sm:$0xff] }
 0x2bd   : > { %v568_v53 = vpop.permute.xlu0 %567 }
 0x2be   : > { %989 = vmatmul.msk.f32.vlgmr.msrb.gmra.mxu2 %vm414_vm1, %v540_v52  ;;  %991 = vmatmul.msk.f32.vlgmr.msrb.gmra.mxu1 %vm414_vm1, %v568_v53 }
 0x2c6   : > { %994 = vmatmul.msk.f32.vlgmr.msra.gmra.mxu2 %vm414_vm1, %v646_v54  ;;  %v831_v54 = vld [vmem:[%s1522_s7 + $0x38] sm:$0xff] }
 0x2c7   : > { %844 = vmatpush.msrb.mxu0 %v831_v54 }
 0x333   : > { %v1406_v55 = vpop.f32.mrf.mxu2 }
 0x33b   : > { %v592_v56 = vpop.f32.mrf.mxu1 }
 0x33c   : > { %v595_v57 = vsel %vm414_vm1, %v592_v56, -inf }
 0x33d   : > { %596 = vmax.xlane.f32.xlu2 %v595_v57  ;;  %v827_v57 = vld [vmem:[%s1522_s7 + $0x18] sm:$0xff] }
 0x341   : > { %v564_v58 = vpop.f32.mrf.mxu2 }
 0x349   : > { %v670_v59 = vpop.f32.mrf.mxu2 }
 0x34a   : > { %v673_v60 = vsel %vm414_vm1, %v670_v59, -inf }
 0x34b   : > { %674 = vmax.xlane.f32.xlu1 %v673_v60 }
 0x364   : > { %697 = vrot.lane.b32.xlu1 %v1380_v7, %s1201_s30  ;;  %s1140_s30 = scalar_lea.hbm %s1139_s29, 8 }
 0x365   : > { %p1141_p6 = scmp.ne.s32.totalorder %s1139_s29, %s1140_s30  ;;  %p1146_p1 = scmp.lt.s32.totalorder %s1144_s17, %s1140_s30 }
 0x367   : > { %p1142_p9 = pnand %p1141_p6, %p1315_p11  ;;  %p1147_p3 = por %p1146_p1, %p1145_p0 }
 0x369   : > { %p1143_p13 = pneg %p1142_p9 }
 0x36b   : > { %p1148_p4 = pnand %p1147_p3, %p1143_p13 }
 0x3b0   : > { %v597_v61 = vpop.xlane.xlu2 %596 }
 0x3b1   : > { %v598_v62 = vsub.f32 %v592_v56, %v597_v61  ;;  %v829_v56 = vld [vmem:[%s1522_s7 + $0x28] sm:$0xff] }
 0x3b2   : > { %v825_v61 = vld [vmem:[%s1522_s7 + $0x8] sm:$0xff] }
 0x3b3   : > { %v599_v63 = vmul.f32 1.442695, %v598_v62 }
 0x3b5   : > { %1078 = vpow2.f32 %v599_v63  ;;  %v824_v63 = vld [vmem:[%s1522_s7] sm:$0xff] }
 0x3bb   : > { %v1079_v0 = vpop.eup %1078 }
 0x3bc   : > { %v601_v1 = vsel %vm414_vm1, %v1079_v0, 0.0 }
 0x3bd   : > { %602 = vadd.xlane.f32.xlu0 %v601_v1 }
 0x3be   : > { %v675_v2 = vpop.xlane.xlu1 %674 }
 0x3bf   : > { %v676_v3 = vsub.f32 %v670_v59, %v675_v2  ;;  %v826_v59 = vld [vmem:[%s1522_s7 + $0x10] sm:$0xff] }
 0x3c1   : > { %v677_v5 = vmul.f32 1.442695, %v676_v3 }
 0x3c3   : > { %1080 = vpow2.f32 %v677_v5 }
 0x3c9   : > { %v1081_v6 = vpop.eup %1080 }
 0x3ca   : > { %v679_v8 = vsel %vm414_vm1, %v1081_v6, 0.0 }
 0x3cb   : > { %680 = vadd.xlane.f32.xlu2 %v679_v8 }
 0x3d1   : > { %724 = vrot.lane.b32.xlu0 %v564_v58, %s1202_s24  ;;  %v1068_v58 = vld [vmem:[%s1521_s6] ss:$0 sm:$0xff] }
 0x3d6   : > { %v698_v9 = vpop.permute.xlu1 %697 }
 0x3d7   : > { %718 = vmatpush.msrb.mxu2 %v698_v9 }
 0x3e3   : > { %619 = vrot.lane.b32.xlu2 %v1380_v7, %s1203_s25 }
 0x430   : > { %v603_v10 = vpop.xlane.xlu0 %602 }
 0x431   : > { %1082 = vrcp.f32 %v603_v10  ;;  %v615_v15 = vand.u32 2147483648, %v603_v10  ;;  %vm609_vm11 = vweird.f32 %v603_v10  ;;  %v613_v17 = vand.u32 2147483647, %v603_v10 }
 0x433   : > { %v616_v20 = vor.u32 1.1754944e-38, %v615_v15  ;;  %vm614_vm13 = vcmp.eq.f32.partialorder %v613_v17, 8.507059e+37  ;;  %v1069_v17 = vld [vmem:[%s1523_s8] ss:$0 sm:$0xff] }
 0x437   : > { %v1083_v11 = vpop.eup %1082 }
 0x438   : > { %v605_v12 = vmul.f32 %v1083_v11, %v603_v10  ;;  %vm610_vm10 = vweird.f32 %v1083_v11 }
 0x439   : > { %vm611_vm12 = vmor %vm609_vm11, %vm610_vm10 }
 0x43a   : > { %v606_v13 = vsub.f32 1.0, %v605_v12 }
 0x43c   : > { %v607_v14 = vmul.f32 %v1083_v11, %v606_v13 }
 0x43e   : > { %v608_v16 = vadd.f32 %v1083_v11, %v607_v14  ;;  %v681_v18 = vpop.xlane.xlu2 %680 }
 0x43f   : > { %1084 = vrcp.f32 %v681_v18  ;;  %v693_v26 = vand.u32 2147483648, %v681_v18  ;;  %v691_v28 = vand.u32 2147483647, %v681_v18  ;;  %vm687_vm15 = vweird.f32 %v681_v18 }
 0x440   : > { %v612_v19 = vsel %vm611_vm12, %v1083_v11, %v608_v16 }
 0x441   : > { %v617_v21 = vsel %vm614_vm13, %v616_v20, %v612_v19  ;;  %v694_v30 = vor.u32 1.1754944e-38, %v693_v26  ;;  %vm692_vm3 = vcmp.eq.f32.partialorder %v691_v28, 8.507059e+37 }
 0x442   : > { %v618_v24 = vmul.f32 %v1079_v0, %v617_v21 }
 0x443   : > { %v725_v42 = vpop.permute.xlu0 %724 }
 0x444   : > { %v735_v44 = vsel %vm414_vm1, %v1406_v55, %v725_v42  ;;  %v830_v55 = vld [vmem:[%s1522_s7 + $0x30] sm:$0xff] }
 0x445   : > { %v1085_v22 = vpop.eup %1084  ;;  %845 = vmatpush.msrb.mxu0 %v830_v55 }
 0x446   : > { %v683_v7 = vmul.f32 %v1085_v22, %v681_v18  ;;  %v620_v23 = vpop.permute.xlu2 %619  ;;  %vm688_vm14 = vweird.f32 %v1085_v22 }
 0x447   : > { %640 = vmatpush.msrb.mxu3 %v620_v23  ;;  %vm689_vm2 = vmor %vm687_vm15, %vm688_vm14  ;;  %846 = vmatpush.msrb.mxu0 %v829_v56 }
 0x448   : > { %v684_v25 = vsub.f32 1.0, %v683_v7  ;;  %992 = vmatmul.msk.f32.vlgmr.msrb.gmra.mxu3 %vm414_vm1, %v618_v24  ;;  %v1206_v7 = vmov 32.0  }
 0x449   : > { %795 = vmatpush.msra.mxu3 %v775_v40 }
 0x44a   : > { %v685_v27 = vmul.f32 %v1085_v22, %v684_v25 }
 0x44b   : > { %796 = vmatpush.msra.mxu3 %v774_v41 }
 0x44c   : > { %v686_v29 = vadd.f32 %v1085_v22, %v685_v27 }
 0x44d   : > { %797 = vmatpush.msra.mxu3 %v773_v48 }
 0x44e   : > { %v690_v31 = vsel %vm689_vm2, %v1085_v22, %v686_v29 }
 0x44f   : > { %v695_v32 = vsel %vm692_vm3, %v694_v30, %v690_v31  ;;  %798 = vmatpush.msra.mxu3 %v772_v49 }
 0x450   : > { %v696_v33 = vmul.f32 %v1081_v6, %v695_v32 }
 0x452   : > { %995 = vmatmul.msk.f32.vlgmr.msrb.gmra.mxu2 %vm414_vm1, %v696_v33 }
 0x4cb   : > { %v642_v34 = vpop.f32.mrf.mxu3 }
 0x4cc   : > { %728 = vrot.lane.b32.xlu2 %v642_v34, %s1204_s11 }
 0x4d5   : > { %v720_v35 = vpop.f32.mrf.mxu2 }
 0x4d6   : > { %732 = vrot.lane.b32.xlu0 %v720_v35, %s1205_s12  ;;  %s874_s12 = sld [smem:[#allocation2]] }
 0x4dc   : > { %v875_v29 = vstv %s874_s12 }
 0x526   : > { %v729_v43 = vpop.permute.xlu2 %728 }
 0x527   : > { %v737_v45 = vsel %vm736_vm4, %v735_v44, %v729_v43 }
 0x548   : > { %v733_v46 = vpop.permute.xlu0 %732 }
 0x549   : > { %v739_v47 = vsel %vm738_vm5, %v737_v45, %v733_v46 }
 0x54a   : > { %996 = vmatmul.msk.f32.vlgmr.msra.gmra.mxu1 %vm387_vm0, %v739_v47 }
 0x5c7   : > { %v768_v51 = vpop.f32.mrf.mxu1 }
 0x5c8   : > { %v769_v52 = vadd.f32 %v1067_v50, %v768_v51 }
 0x5ca   : > { %v771_v53 = vadd.f32 %v769_v52, %v1373_v4  ;;  %v828_v4 = vld [vmem:[%s1522_s7 + $0x20] sm:$0xff] }
 0x5cb   : > { %847 = vmatpush.msrb.mxu0 %v828_v4 }
 0x5cc   : > { %997 = vmatmul.msk.f32.vlgmr.msra.gmra.mxu3 %vm387_vm0, %v771_v53 }
 0x5cd   : > { %848 = vmatpush.msrb.mxu0 %v827_v57 }
 0x5cf   : > { %849 = vmatpush.msrb.mxu0 %v826_v59 }
 0x5d1   : > { %850 = vmatpush.msrb.mxu0 %v825_v61 }
 0x5d3   : > { %851 = vmatpush.msrb.mxu0 %v824_v63 }
 0x64f   : > { %v800_v60 = vpop.f32.mrf.mxu3 }
 0x650   : > { %v801_v62 = vadd.f32 %v1068_v58, %v800_v60 }
 0x652   : > { %v998_v0 = vadd.f32 -1.0, %v801_v62 }
 0x654   : > { %v999_v1 = vmul.f32 -1.442695, %v998_v0 }
 0x656   : > { %1086 = vpow2.f32 %v999_v1 }
 0x65c   : > { %v1087_v2 = vpop.eup %1086 }
 0x65d   : > { %v807_v3 = vadd.f32 1.0, %v1087_v2 }
 0x65f   : > { %1088 = vrcp.f32 %v807_v3  ;;  %v819_v9 = vand.u32 2147483648, %v807_v3  ;;  %v817_v11 = vand.u32 2147483647, %v807_v3  ;;  %vm813_vm6 = vweird.f32 %v807_v3 }
 0x660   : > { %1090 = vrcp.f32 %v1206_v7 }
 0x661   : > { %v820_v13 = vor.u32 1.1754944e-38, %v819_v9  ;;  %vm818_vm8 = vcmp.eq.f32.partialorder %v817_v11, 8.507059e+37 }
 0x665   : > { %v1089_v5 = vpop.eup %1088 }
 0x666   : > { %v809_v6 = vmul.f32 %v1089_v5, %v807_v3  ;;  %vm814_vm1 = vweird.f32 %v1089_v5  ;;  %v1091_v23 = vpop.eup %1090 }
 0x667   : > { %vm815_vm7 = vmor %vm813_vm6, %vm814_vm1  ;;  %v867_v24 = vmul.f32 32.0, %v1091_v23  ;;  %vm871_vm10 = vweird.f32 %v1091_v23 }
 0x668   : > { %v810_v8 = vsub.f32 1.0, %v809_v6 }
 0x669   : > { %v868_v25 = vsub.f32 1.0, %v867_v24 }
 0x66a   : > { %v811_v10 = vmul.f32 %v1089_v5, %v810_v8 }
 0x66b   : > { %v869_v26 = vmul.f32 %v1091_v23, %v868_v25 }
 0x66c   : > { %v812_v12 = vadd.f32 %v1089_v5, %v811_v10 }
 0x66d   : > { %v870_v27 = vadd.f32 %v1091_v23, %v869_v26 }
 0x66e   : > { %v816_v14 = vsel %vm815_vm7, %v1089_v5, %v812_v12 }
 0x66f   : > { %v821_v15 = vsel %vm818_vm8, %v820_v13, %v816_v14  ;;  %v872_v28 = vsel %vm871_vm10, %v1091_v23, %v870_v27 }
 0x670   : > { %v823_v16 = vmul.f32 %v821_v15, %v801_v62 }
 0x672   : > { %1000 = vmatmul.msk.f32.vlgmr.msrb.gmra.mxu0 %vm832_vm9, %v823_v16 }
 0x6ef   : > { %v853_v18 = vpop.f32.mrf.mxu0 }
 0x6f0   : > { %v856_v19 = vadd.f32 %v853_v18, %v771_v53 }
 0x6f2   : > { %v861_v20 = vadd.f32 %v1069_v17, %v856_v19 }
 0x6f4   : > { %v862_v21 = vmul.f32 %v861_v20, %v861_v20 }
 0x6f6   : > { %v863_v22 = vsel %vm387_vm0, %v862_v21, 0.0 }
 0x6f7   : > { %864 = vadd.xlane.f32.xlu1 %v863_v22 }
 0x76a   : > { %v865_v30 = vpop.xlane.xlu1 %864 }
 0x76b   : > { %v873_v31 = vmul.f32 %v872_v28, %v865_v30 }
 0x76d   : > { %v876_v32 = vadd.f32 %v875_v29, %v873_v31 }
 0x76f   : > { %1092 = vrsqrt.f32 %v876_v32  ;;  %vm883_vm12 = vweird.f32 %v876_v32 }
 0x775   : > { %v1093_v33 = vpop.eup %1092 }
 0x776   : > { %v878_v34 = vmul.f32 %v1093_v33, %v876_v32  ;;  %vm884_vm11 = vweird.f32 %v1093_v33 }
 0x777   : > { %vm885_vm13 = vmor %vm883_vm12, %vm884_vm11 }
 0x778   : > { %v879_v35 = vmul.f32 %v1093_v33, %v878_v34 }
 0x77a   : > { %v880_v36 = vmul.f32 0.5, %v879_v35 }
 0x77c   : > { %v881_v37 = vsub.f32 1.5, %v880_v36 }
 0x77e   : > { %v882_v38 = vmul.f32 %v1093_v33, %v881_v37 }
 0x780   : > { %v886_v39 = vsel %vm885_vm13, %v1093_v33, %v882_v38 }
 0x781   : > { %v887_v40 = vmul.f32 %v886_v39, %v861_v20 }
 0x783   : > { %888 = vst.msk [vmem:[%s377_s19] sm:$0xff] %vm387_vm0, %v887_v40 }
 0x784   : > { %1151 = shalt.err (!%p1148_p4)
}
 0x785   : > { %1007 = dma.vmem_to_hbm [thread:$0]  (%p1315_p11), %s903_s21, 128, %s905_s22, %s890_s9  }
 0x786 PF: > { %s916_s28 = sand.u32 1, %s1178_s15   ;;  %p1537_p7 = scmp.ge.s32.totalorder %s1190_s18, 2 }
 0x787   : > { %s917_s20 = scalar_lea.sflag [#allocation5], %s916_s28 }
 0x788   : > { %p1014_p5 = pnand %p1537_p7, %p1319_p12 }
 0x78a   : > { %p1015_p8 = pneg %p1014_p5 }
 0x78c   : > { %1173 = dma.done.wait (%p1015_p8), %s917_s20, 128  }
 0x78d   : > { %1175 = vsyncadd (%p1015_p8), %s917_s20, 4294967168  ;;  %s1538_s18 = sld [smem:[#allocation10_spill]]  ;;  %s1541_s15 = smov %s1182_s16 }
 0x78e   : > { %s1539_s13 = sld [smem:[#allocation9_spill]] }
 0x78f   : > { %s1540_s17 = sld [smem:[#allocation11_spill]] }
 0x793   : > { %p24_p10 = scmp.ge.s32.totalorder %s1538_s18, 4  }
 0x794   : > { %s1542_s16 = smov %s1539_s13 }
 0x795   :  { %26 = sbr.rel (!%p24_p10) target bundleno = 7 (0x7), region = 105 }
 0x79a   :  { %923 = vsyncpa [#allocation4], 1 }
 0x79b   :  { %925 = vsyncpa [#allocation4 + $0x1], 1 }
 0x79c   :  { %926 = vsyncpa [#allocation5], 1 }
 0x79d   :  { %928 = vsyncpa [#allocation5 + $0x1], 1 }

</bundles_post_ra>
